<compile_context>
chip_gen: v5e
topology: v5e:2x2
jax: 0.10.0
libtpu: 0.0.40
codegen_flags: <defaults>
</compile_context>

<pallas_src>
import functools

import jax
import jax.numpy as jnp
from jax.experimental import pallas as pl
from jax.experimental.pallas import tpu as pltpu


def _silu(v):
    return v * jax.nn.sigmoid(v)


def _time_embedding_kernel(x_ref, w1_ref, b1_ref, w2_ref, b2_ref, o_ref,
                           xb_ref, acc_ref, *, finalize):
    # Grid = (core, hidden_tile); the hidden axis is a reduction.
    k = pl.program_id(1)

    @pl.when(k == 0)
    def _init():
        acc_ref[...] = jnp.zeros_like(acc_ref)
        # Cast x to the MXU dtype once per (core, call), not once per step.
        xb_ref[...] = x_ref[...].astype(xb_ref.dtype)

    # First linear on this hidden tile: (B, D) @ (D, tH) on the bf16 MXU path,
    # f32 accumulation; bias add + SiLU in f32.  The in-kernel astype on the
    # weight tile is a no-op when the weights are already persisted as bf16.
    h = jnp.dot(xb_ref[...], w1_ref[...].astype(jnp.bfloat16),
                preferred_element_type=jnp.float32)
    h = _silu(h + b1_ref[...].astype(jnp.float32))

    # Second linear, partial sum over this hidden tile: (B, tH) @ (tH, D),
    # accumulated into the resident f32 scratch.
    acc_ref[...] += jnp.dot(h.astype(jnp.bfloat16),
                            w2_ref[...].astype(jnp.bfloat16),
                            preferred_element_type=jnp.float32)

    @pl.when(k == pl.num_programs(1) - 1)
    def _finish():
        if finalize:
            # Single-core path: b2 + trailing SiLU fused in-kernel.
            o_ref[...] = _silu(acc_ref[...] + b2_ref[...].astype(jnp.float32)
                               ).astype(o_ref.dtype)
        else:
            # Multi-core path: emit the per-core f32 partial sum; the tiny
            # cross-core combine + b2 + SiLU happen in the wrapper.
            o_ref[...] = acc_ref[...]


def _pick_tile_h(H, max_tile, num_cores):
    """Largest tile <= max_tile dividing H, steps divisible by num_cores.

    Prefers multiples of 256 (v6e/v7x MXU width), falls back to 128.
    """
    for align in (256, 128):
        t = (min(H, max_tile) // align) * align
        while t >= align:
            if H % t == 0 and (H // t) % num_cores == 0:
                return t
            t -= align
    return 0


def time_embedding(x, w1, b1, w2, b2, *, tile_h=None, num_cores=1,
                   weight_buffers=2):
    """TimeEmbedding forward: silu(silu(x @ w1 + b1) @ w2 + b2).

    x : (B, D)
    w1: (D, H)   PyTorch Linear(dim, 4*dim) weight stored (in, out)
    b1: (1, H)
    w2: (H, D)   PyTorch Linear(4*dim, dim) weight stored (in, out)
    b2: (1, D)

    Weights are used in the dtype they are passed in -- persist them in bf16
    once at model-load time to halve the (dominant) weight DMA; this wrapper
    never re-casts them per call.  num_cores=2 targets v7x (splits the hidden
    reduction across TensorCores); weight_buffers=3 optionally deepens the
    weight-tile pipeline when VMEM headroom allows (0-5% on a DMA-bound op).
    """
    B, D = x.shape
    H = w1.shape[1]
    assert w1.shape == (D, H) and w2.shape == (H, D)
    assert b1.shape == (1, H) and b2.shape == (1, D)
    assert H % 128 == 0, "hidden dim (4*dim) must be a multiple of 128"
    assert (H // 128) % num_cores == 0, "hidden tiles must split across cores"
    assert weight_buffers in (2, 3)

    w_bytes = jnp.dtype(w1.dtype).itemsize
    x_bytes = jnp.dtype(x.dtype).itemsize

    # --- VMEM-capacity-aware tile sizing (64 MiB on v7x, 128 MiB v5e/v6e) ---
    try:
        vmem_cap = pltpu.get_tpu_info().vmem_capacity_bytes
    except Exception:
        vmem_cap = 64 * 1024 * 1024  # conservative fallback (v7x per-core)

    if tile_h is None:
        # Budget ~45% of VMEM for the double-buffered (w1 col + w2 row) tiles.
        per_col_bytes = 2 * 2 * D * w_bytes
        max_tile = min(2048, H, max(128, int(vmem_cap * 0.45) // per_col_bytes))
        tile_h = _pick_tile_h(H, max_tile, num_cores)
    assert tile_h and H % tile_h == 0 and tile_h % 128 == 0
    n_steps = H // tile_h
    assert n_steps % num_cores == 0
    steps_per_core = n_steps // num_cores

    def _vmem_needed(n_buf):
        weight_tiles = n_buf * (2 * D * tile_h * w_bytes + tile_h * 4)  # w1+w2+b1
        residents = 2 * B * D * x_bytes + 2 * B * D * 4 + 2 * D * 4     # x, out, b2
        scratch = B * D * 2 + B * D * 4                                 # xb + acc
        return weight_tiles + residents + scratch

    if weight_buffers == 3 and _vmem_needed(3) > int(vmem_cap * 0.6):
        weight_buffers = 2  # skip triple buffering if it pressures VMEM
    vmem_limit = min(max(int(_vmem_needed(weight_buffers) * 1.25) + (2 << 20),
                         32 * 1024 * 1024),
                     int(vmem_cap * 0.9))

    # --- specs ---------------------------------------------------------------
    spc = steps_per_core
    w_kwargs = ({"pipeline_mode": pl.Buffered(weight_buffers)}
                if weight_buffers != 2 else {})
    in_specs = [
        pl.BlockSpec((B, D), lambda c, k: (0, 0)),                        # x (resident)
        pl.BlockSpec((D, tile_h), lambda c, k: (0, c * spc + k), **w_kwargs),  # w1 cols
        pl.BlockSpec((1, tile_h), lambda c, k: (0, c * spc + k)),         # b1 tile
        pl.BlockSpec((tile_h, D), lambda c, k: (c * spc + k, 0), **w_kwargs),  # w2 rows
        pl.BlockSpec((1, D), lambda c, k: (0, 0)),                        # b2 (resident)
    ]

    finalize = (num_cores == 1)
    if finalize:
        out_shape = jax.ShapeDtypeStruct((B, D), x.dtype)
        out_specs = pl.BlockSpec((B, D), lambda c, k: (0, 0))
    else:
        out_shape = jax.ShapeDtypeStruct((num_cores, B, D), jnp.float32)
        out_specs = pl.BlockSpec((None, B, D), lambda c, k: (c, 0, 0))

    grid_spec = pltpu.PrefetchScalarGridSpec(
        num_scalar_prefetch=0,
        grid=(num_cores, steps_per_core),
        in_specs=in_specs,
        out_specs=out_specs,
        scratch_shapes=[
            pltpu.VMEM((B, D), jnp.bfloat16),   # x cast once to MXU dtype
            pltpu.VMEM((B, D), jnp.float32),    # resident f32 accumulator
        ],
    )

    dim_sems = ((pltpu.CORE_PARALLEL if num_cores > 1 else pltpu.ARBITRARY),
                pltpu.ARBITRARY)  # hidden axis is a reduction

    bytes_accessed = ((w1.size + w2.size) * w_bytes
                      + x.size * x_bytes
                      + (b1.size + b2.size + B * D) * 4)
    out = pl.pallas_call(
        functools.partial(_time_embedding_kernel, finalize=finalize),
        out_shape=out_shape,
        grid_spec=grid_spec,
        compiler_params=pltpu.CompilerParams(
            dimension_semantics=dim_sems,
            vmem_limit_bytes=vmem_limit,
        ),
        cost_estimate=pl.CostEstimate(
            flops=4 * B * D * H,
            transcendentals=B * (H + D),
            bytes_accessed=bytes_accessed,
        ),
    )(x, w1, b1, w2, b2)

    if finalize:
        return out
    # v7x multi-core path: tiny (num_cores, B, D) combine + b2 + trailing SiLU.
    return jax.nn.silu(out.sum(axis=0) + b2.astype(jnp.float32)).astype(x.dtype)


def time_embedding_ref(x, w1, b1, w2, b2):
    # Mirrors the kernel numerics: bf16 matmul operands, f32 accumulation.
    h = jnp.dot(x.astype(jnp.bfloat16), w1.astype(jnp.bfloat16),
                preferred_element_type=jnp.float32) + b1.astype(jnp.float32)
    h = jax.nn.silu(h)
    y = jnp.dot(h.astype(jnp.bfloat16), w2.astype(jnp.bfloat16),
                preferred_element_type=jnp.float32) + b2.astype(jnp.float32)
    return jax.nn.silu(y)


if __name__ == "__main__":
    # Small shapes consistent with TimeEmbedding(dim): dim=128, hidden=4*dim=512.
    B, D = 8, 128
    H = 4 * D

    key = jax.random.PRNGKey(0)
    kx, kw1, kb1, kw2, kb2 = jax.random.split(key, 5)

    x = jax.random.normal(kx, (B, D), dtype=jnp.float32)
    # "Model load": weights persisted ONCE as bf16 (MXU-native, halves the
    # dominant weight DMA).  Biases stay f32.  No per-call casts in the wrapper.
    w1 = (jax.random.normal(kw1, (D, H), dtype=jnp.float32) * D ** -0.5
          ).astype(jnp.bfloat16)
    w2 = (jax.random.normal(kw2, (H, D), dtype=jnp.float32) * H ** -0.5
          ).astype(jnp.bfloat16)
    b1 = jax.random.normal(kb1, (1, H), dtype=jnp.float32) * 0.01
    b2 = jax.random.normal(kb2, (1, D), dtype=jnp.float32) * 0.01

    ref = time_embedding_ref(x, w1, b1, w2, b2)

    # 1) Forced small tile (tile_h=128 -> 4 hidden tiles): exercises the
    #    pipelined accumulation path.
    out_tiled = jax.block_until_ready(
        time_embedding(x, w1, b1, w2, b2, tile_h=128))
    # 2) Default VMEM-aware auto tile (here a single tile): production config.
    out_auto = jax.block_until_ready(time_embedding(x, w1, b1, w2, b2))

    for out in (out_tiled, out_auto):
        assert out.shape == (B, D)
        assert out.dtype == x.dtype
        err = float(jnp.max(jnp.abs(out - ref)))
        assert jnp.allclose(out, ref, atol=2e-2, rtol=2e-2), (
            "max abs err = %f" % err)
    print("KERNEL_OK")
</pallas_src>

<mosaic_0001>
module attributes {stable_mosaic.version = 11 : i64} {
  func.func @_time_embedding_kernel(%arg0: i32, %arg1: i32, %arg2: memref<8x128xf32, #tpu.memory_space<vmem>>, %arg3: memref<128x128xbf16, #tpu.memory_space<vmem>>, %arg4: memref<1x128xf32, #tpu.memory_space<vmem>>, %arg5: memref<128x128xbf16, #tpu.memory_space<vmem>>, %arg6: memref<1x128xf32, #tpu.memory_space<vmem>>, %arg7: memref<8x128xf32, #tpu.memory_space<vmem>>, %arg8: memref<8x128xbf16, #tpu.memory_space<vmem>>, %arg9: memref<8x128xf32, #tpu.memory_space<vmem>>) attributes {dimension_semantics = [#tpu.dimension_semantics<arbitrary>, #tpu.dimension_semantics<arbitrary>], iteration_bounds = array<i64: 1, 4>, scalar_prefetch = 0 : i64, scratch_operands = 2 : i64, tpu.core_type = #tpu.core_type<tc>, window_params = [{pipeline_mode = #tpu.pipeline_mode<synchronous>, transform_indices = @transform_0, window_bounds = array<i64: 8, 128>}, {transform_indices = @transform_1, window_bounds = array<i64: 128, 128>}, {transform_indices = @transform_2, window_bounds = array<i64: 1, 128>}, {transform_indices = @transform_3, window_bounds = array<i64: 128, 128>}, {pipeline_mode = #tpu.pipeline_mode<synchronous>, transform_indices = @transform_4, window_bounds = array<i64: 1, 128>}, {pipeline_mode = #tpu.pipeline_mode<synchronous>, transform_indices = @transform_5, window_bounds = array<i64: 8, 128>}]} {
    %c0_i32 = arith.constant 0 : i32
    %0 = arith.cmpi eq, %arg1, %c0_i32 : i32
    %1 = arith.extui %0 : i1 to i32
    %c0_i32_0 = arith.constant 0 : i32
    %2 = arith.cmpi ne, %1, %c0_i32_0 : i32
    scf.if %2 {
      %cst_15 = arith.constant 0.000000e+00 : f32
      %24 = vector.broadcast %cst_15 : f32 to vector<8x128xf32>
      %c0_16 = arith.constant 0 : index
      %c0_17 = arith.constant 0 : index
      %25 = vector.load %arg9[%c0_16, %c0_17] : memref<8x128xf32, #tpu.memory_space<vmem>>, vector<8x128xf32>
      tpu.vector_store %arg9[%c0_16, %c0_17], %24 {strides = array<i32>} : memref<8x128xf32, #tpu.memory_space<vmem>>, vector<8x128xf32>,
      %c0_18 = arith.constant 0 : index
      %c0_19 = arith.constant 0 : index
      %26 = vector.load %arg2[%c0_18, %c0_19] : memref<8x128xf32, #tpu.memory_space<vmem>>, vector<8x128xf32>
      %27 = arith.truncf %26 : vector<8x128xf32> to vector<8x128xbf16>
      %c0_20 = arith.constant 0 : index
      %c0_21 = arith.constant 0 : index
      %28 = vector.load %arg8[%c0_20, %c0_21] : memref<8x128xbf16, #tpu.memory_space<vmem>>, vector<8x128xbf16>
      tpu.vector_store %arg8[%c0_20, %c0_21], %27 {strides = array<i32>} : memref<8x128xbf16, #tpu.memory_space<vmem>>, vector<8x128xbf16>,
    } else {
    }
    %c0 = arith.constant 0 : index
    %c0_1 = arith.constant 0 : index
    %3 = vector.load %arg8[%c0, %c0_1] : memref<8x128xbf16, #tpu.memory_space<vmem>>, vector<8x128xbf16>
    %c0_2 = arith.constant 0 : index
    %c0_3 = arith.constant 0 : index
    %4 = vector.load %arg3[%c0_2, %c0_3] : memref<128x128xbf16, #tpu.memory_space<vmem>>, vector<128x128xbf16>
    %cst = arith.constant dense<0.000000e+00> : vector<8x128xf32>
    %5 = tpu.matmul %3, %4, %cst {dimension_numbers = #tpu.dot_dimension_numbers<[1], [0], [0], [1], [0, 0, 1, 1], [], []>} : vector<8x128xbf16>, vector<128x128xbf16>, vector<8x128xf32> -> vector<8x128xf32>
    %c0_4 = arith.constant 0 : index
    %c0_5 = arith.constant 0 : index
    %6 = vector.load %arg4[%c0_4, %c0_5] : memref<1x128xf32, #tpu.memory_space<vmem>>, vector<1x128xf32>
    %7 = vector.broadcast %6 : vector<1x128xf32> to vector<8x128xf32>
    %8 = arith.addf %5, %7 : vector<8x128xf32>
    %9 = arith.negf %8 : vector<8x128xf32>
    %10 = math.exp %9 : vector<8x128xf32>
    %cst_6 = arith.constant 1.000000e+00 : f32
    %11 = vector.broadcast %cst_6 : f32 to vector<8x128xf32>
    %12 = arith.addf %11, %10 : vector<8x128xf32>
    %13 = arith.divf %11, %12 : vector<8x128xf32>
    %14 = arith.mulf %8, %13 : vector<8x128xf32>
    %c0_7 = arith.constant 0 : index
    %c0_8 = arith.constant 0 : index
    %15 = vector.load %arg9[%c0_7, %c0_8] : memref<8x128xf32, #tpu.memory_space<vmem>>, vector<8x128xf32>
    %16 = arith.truncf %14 : vector<8x128xf32> to vector<8x128xbf16>
    %c0_9 = arith.constant 0 : index
    %c0_10 = arith.constant 0 : index
    %17 = vector.load %arg5[%c0_9, %c0_10] : memref<128x128xbf16, #tpu.memory_space<vmem>>, vector<128x128xbf16>
    %cst_11 = arith.constant dense<0.000000e+00> : vector<8x128xf32>
    %18 = tpu.matmul %16, %17, %cst_11 {dimension_numbers = #tpu.dot_dimension_numbers<[1], [0], [0], [1], [0, 0, 1, 1], [], []>} : vector<8x128xbf16>, vector<128x128xbf16>, vector<8x128xf32> -> vector<8x128xf32>
    %19 = arith.addf %15, %18 : vector<8x128xf32>
    %c0_12 = arith.constant 0 : index
    %c0_13 = arith.constant 0 : index
    %20 = vector.load %arg9[%c0_12, %c0_13] : memref<8x128xf32, #tpu.memory_space<vmem>>, vector<8x128xf32>
    tpu.vector_store %arg9[%c0_12, %c0_13], %19 {strides = array<i32>} : memref<8x128xf32, #tpu.memory_space<vmem>>, vector<8x128xf32>,
    %c3_i32 = arith.constant 3 : i32
    %21 = arith.cmpi eq, %arg1, %c3_i32 : i32
    %22 = arith.extui %21 : i1 to i32
    %c0_i32_14 = arith.constant 0 : i32
    %23 = arith.cmpi ne, %22, %c0_i32_14 : i32
    scf.if %23 {
      %c0_15 = arith.constant 0 : index
      %c0_16 = arith.constant 0 : index
      %24 = vector.load %arg9[%c0_15, %c0_16] : memref<8x128xf32, #tpu.memory_space<vmem>>, vector<8x128xf32>
      %c0_17 = arith.constant 0 : index
      %c0_18 = arith.constant 0 : index
      %25 = vector.load %arg6[%c0_17, %c0_18] : memref<1x128xf32, #tpu.memory_space<vmem>>, vector<1x128xf32>
      %26 = vector.broadcast %25 : vector<1x128xf32> to vector<8x128xf32>
      %27 = arith.addf %24, %26 : vector<8x128xf32>
      %28 = arith.negf %27 : vector<8x128xf32>
      %29 = math.exp %28 : vector<8x128xf32>
      %cst_19 = arith.constant 1.000000e+00 : f32
      %30 = vector.broadcast %cst_19 : f32 to vector<8x128xf32>
      %31 = arith.addf %30, %29 : vector<8x128xf32>
      %32 = arith.divf %30, %31 : vector<8x128xf32>
      %33 = arith.mulf %27, %32 : vector<8x128xf32>
      %c0_20 = arith.constant 0 : index
      %c0_21 = arith.constant 0 : index
      %34 = vector.load %arg7[%c0_20, %c0_21] : memref<8x128xf32, #tpu.memory_space<vmem>>, vector<8x128xf32>
      tpu.vector_store %arg7[%c0_20, %c0_21], %33 {strides = array<i32>} : memref<8x128xf32, #tpu.memory_space<vmem>>, vector<8x128xf32>,
    } else {
    }
    return
  }
  func.func @transform_0(%arg0: i32, %arg1: i32) -> (i32, i32) {
    %c0_i32 = arith.constant 0 : i32
    %c0_i32_0 = arith.constant 0 : i32
    %c0_i32_1 = arith.constant 0 : i32
    return %c0_i32, %c0_i32_0 : i32, i32
  }
  func.func @transform_1(%arg0: i32, %arg1: i32) -> (i32, i32) {
    %c4_i32 = arith.constant 4 : i32
    %0 = arith.muli %arg0, %c4_i32 : i32
    %1 = arith.addi %0, %arg1 : i32
    %c0_i32 = arith.constant 0 : i32
    %c0_i32_0 = arith.constant 0 : i32
    return %c0_i32, %1 : i32, i32
  }
  func.func @transform_2(%arg0: i32, %arg1: i32) -> (i32, i32) {
    %c4_i32 = arith.constant 4 : i32
    %0 = arith.muli %arg0, %c4_i32 : i32
    %1 = arith.addi %0, %arg1 : i32
    %c0_i32 = arith.constant 0 : i32
    %c0_i32_0 = arith.constant 0 : i32
    return %c0_i32, %1 : i32, i32
  }
  func.func @transform_3(%arg0: i32, %arg1: i32) -> (i32, i32) {
    %c4_i32 = arith.constant 4 : i32
    %0 = arith.muli %arg0, %c4_i32 : i32
    %1 = arith.addi %0, %arg1 : i32
    %c0_i32 = arith.constant 0 : i32
    %c0_i32_0 = arith.constant 0 : i32
    return %1, %c0_i32 : i32, i32
  }
  func.func @transform_4(%arg0: i32, %arg1: i32) -> (i32, i32) {
    %c0_i32 = arith.constant 0 : i32
    %c0_i32_0 = arith.constant 0 : i32
    %c0_i32_1 = arith.constant 0 : i32
    return %c0_i32, %c0_i32_0 : i32, i32
  }
  func.func @transform_5(%arg0: i32, %arg1: i32) -> (i32, i32) {
    %c0_i32 = arith.constant 0 : i32
    %c0_i32_0 = arith.constant 0 : i32
    %c0_i32_1 = arith.constant 0 : i32
    return %c0_i32, %c0_i32_0 : i32, i32
  }
}

</mosaic_0001>

<bundles_post_ra>
// kernel: tpu_custom_call.1
= control target key start
LH: loop header
LB: loop body
LE: loop exit
PB: predicated region body
PF: predicated region fallthrough
CT: control target
= control target key end

     0   :  { %s1323_s0 = inlined_call_operand.hbm [shape: f32[8,128], index: 0, kind: input, shape index: {}]   ;;  %s1324_s1 = inlined_call_operand.hbm [shape: bf16[128,512], index: 1, kind: input, shape index: {}]   ;;  %s1325_s2 = inlined_call_operand.hbm [shape: f32[1,512], index: 2, kind: input, shape index: {}]   ;;  %s1326_s3 = inlined_call_operand.hbm [shape: bf16[512,128], index: 3, kind: input, shape index: {}]   ;;  %s1327_s4 = inlined_call_operand.vmem [shape: f32[1,128], index: 4, kind: input, shape index: {}]   ;;  %s1328_s5 = inlined_call_operand.hbm [shape: f32[8,128], index: 5, kind: output, shape index: {}]  }
   0x1   :  { %1332 = sst [smem:[#allocation18_spill]] %s1323_s0 }
   0x2   :  { %1333 = sst [smem:[#allocation19_spill]] %s1324_s1 }
   0x3   :  { %1334 = sst [smem:[#allocation20_spill]] %s1325_s2 }
   0x4   :  { %10 = vsyncpa [#allocation5], 0 }
   0x5   :  { %11 = vsyncpa [#allocation8], 0 }
   0x6   :  { %13 = vsyncpa [#allocation8 + $0x1], 0 }
   0x7   :  { %14 = vsyncpa [#allocation11], 0 }
   0x8   :  { %16 = vsyncpa [#allocation11 + $0x1], 0 }
   0x9   :  { %17 = vsyncpa [#allocation6], 0  ;;  %s1149_s18 = smov 0   ;;  %s1151_s19 = smov 0  }
   0xa   :  { %s1153_s20 = smov 0   ;;  %s1155_s21 = smov 0  }
   0xb   :  { %s1157_s22 = smov 0   ;;  %s1159_s23 = smov 0  }
   0xc LB: > { %s32_s24 = sadd.s32 1, %s1107_s22  ;;  %s67_s25 = sadd.s32 1, %s1099_s20  ;;  %s1111_s23 = sphi %s1159_s23, %s23_s23   ;;  %s1107_s22 = sphi %s1157_s22, %s1350_s22   ;;  %s1103_s21 = sphi %s1155_s21, %s1349_s21   ;;  %s1099_s20 = sphi %s1153_s20, %s1348_s20   ;;  %s1095_s19 = sphi %s1151_s19, %s1347_s19   ;;  %s1091_s18 = sphi %s1149_s18, %s1346_s18  }
   0xd   : > { %p33_p0 = scmp.ge.s32.totalorder %s32_s24, 4  ;;  %p74_p1 = scmp.ne.s32.totalorder %s1099_s20, %s1095_s19 }
   0xe   : > { %p75_p2 = scmp.eq.s32.totalorder %s1111_s23, 0  ;;  %p833_p4 = scmp.lt.s32.totalorder %s1111_s23, 4 }
   0xf   : > { %s1352_s24 = smov (%p33_p0, %s32_s24), 0  ;;  %s221_s28 = sand.u32 1, %s1111_s23  }
  0x10   : > { %1335 = sst [smem:[#allocation17_spill]] %s1352_s24  ;;  %p1186_p3 = por %p75_p2, %p74_p1 }
  0x11   : > { %s64_s27 = ssub.s32 %s1107_s22, %s1352_s24  ;;  %s1195_s29 = sand.u32 1, %s1099_s20  }
  0x12   : > { %p65_p5 = scmp.eq.s32.totalorder %s64_s27, 0  ;;  %s707_s30 = sshll.u32 %s1107_s22, 2 }
  0x13   : > { %s706_s7 = sshll.u32 %s1195_s29, 6  ;;  %s1337_s1 = sld [smem:[#allocation19_spill]] }
  0x14   : > { %s1199_s6 = scalar_select %p65_p5, %s1099_s20, %s67_s25  }
  0x15   : > { %s225_s12 = scalar_lea.vmem [#allocation7], %s706_s7  ;;  %p1211_p6 = pnand %p833_p4, %p1186_p3 }
  0x16   : > { %s234_s13 = sshll.u32 %s225_s12, 4  ;;  %s222_s15 = scalar_lea.sflag [#allocation8], %s221_s28  ;;  %s235_s13 = int_to_ptr.vmem [resolvable:$true] %s234_s13 }
  0x17   : > { %s1113_s16 = smov 256   ;;  %s1329_s17 = smov 64  }
  0x18   : > { %s1330_s25 = smov 4   ;;  %s1220_s27 = sadd.s32 4294967295, %s1111_s23  }
  0x19   : > { %s231_s10 = scalar_lea.hbm %s1337_s1, %s707_s30  ;;  %p80_p7 = scmp.ne.s32.totalorder %s1095_s19, %s1091_s18 }
  0x1a   : > { %s232_s11 = sshll.u32 %s231_s10, 4  ;;  %p81_p8 = scmp.eq.s32.totalorder %s1220_s27, 0  ;;  %s233_s11 = int_to_ptr.hbm [resolvable:$true] %s232_s11 }
  0x1b   : > { %825 = dma.hbm_to_vmem [thread:$0]  (!%p1211_p6), %s233_s11, 1024, %s235_s13, %s222_s15, %s1113_s16, %s1329_s17, %s1330_s25  }
  0x1c   : > { %p703_p9 = scmp.ge.s32.totalorder %s1111_s23, 1  ;;  %p193_p10 = scmp.lt.s32.totalorder %s1111_s23, 5 }
  0x1d   : > { %p1229_p11 = por %p81_p8, %p80_p7  ;;  %s1340_s0 = sld [smem:[#allocation18_spill]] }
  0x1e   : > { %p1236_p12 = pnand %p703_p9, %p193_p10  ;;  %s1116_s18 = smov [#allocation4]  }
  0x1f   : > { %s207_s10 = sshll.u32 %s1116_s18, 4  ;;  %s1342_s2 = sld [smem:[#allocation20_spill]]  ;;  %s208_s10 = int_to_ptr.vmem [resolvable:$true] %s207_s10 }
  0x20   : > { %p818_p13 = pneg %p1236_p12  ;;  %s247_s28 = scalar_lea.vmem [#allocation9], %s1195_s29 }
  0x21   : > { %s256_s30 = sshll.u32 %s247_s28, 4  ;;  %s787_s17 = sshll.u32 %s1107_s22, 6  ;;  %s257_s30 = int_to_ptr.vmem [resolvable:$true] %s256_s30 }
  0x22   : > { %p819_p0 = pnand %p818_p13, %p81_p8  ;;  %s267_s18 = scalar_lea.vmem [#allocation10], %s706_s7 }
  0x23   : > { %s205_s8 = sshll.u32 %s1340_s0, 4  ;;  %s277_s25 = sshll.u32 %s267_s18, 4  ;;  %s206_s8 = int_to_ptr.hbm [resolvable:$true] %s205_s8  ;;  %s278_s25 = int_to_ptr.vmem [resolvable:$true] %s277_s25 }
  0x24   : > { %821 = dma.hbm_to_vmem [thread:$0]  (!%p819_p0), %s206_s8, 128, %s208_s10, [#allocation5]  }
  0x25   : > { %s252_s13 = scalar_lea.hbm %s1342_s2, %s1107_s22  ;;  %s274_s11 = scalar_lea.hbm %s1326_s3, %s787_s17 }
  0x26   : > { %s254_s16 = sshll.u32 %s252_s13, 4  ;;  %s275_s12 = sshll.u32 %s274_s11, 4  ;;  %s255_s16 = int_to_ptr.hbm [resolvable:$true] %s254_s16  ;;  %s276_s12 = int_to_ptr.hbm [resolvable:$true] %s275_s12 }
  0x27   : > { %828 = dma.hbm_to_vmem [thread:$0]  (!%p1211_p6), %s255_s16, 16, %s257_s30, %s222_s15  }
  0x28   : > { %s264_s2 = scalar_lea.sflag [#allocation11], %s1195_s29  ;;  %s1343_s13 = smov 4  }
  0x29   : > { %s1344_s24 = smov 64   ;;  %289 = sbr.rel (%p1236_p12) target bundleno = 432 (0x1b0), region = 40 }
  0x2a   : > { %831 = dma.hbm_to_vmem [thread:$0]  (!%p1211_p6), %s276_s12, 1024, %s278_s25, %s264_s2, %s1344_s24, %s1344_s24, %s1343_s13  }
  0x2e   : > { %1074 = dma.done.wait (%p81_p8), [#allocation5], 128  }
  0x2f   : > { %1076 = vsyncadd (%p81_p8), [#allocation5], 4294967168  ;;  %s296_s0 = sand.u32 1, %s1220_s27   ;;  %s1271_s1 = sand.u32 1, %s1095_s19  }
  0x30   : > { %s713_s29 = sshll.u32 %s1271_s1, 6  ;;  %s297_s7 = scalar_lea.sflag [#allocation8], %s296_s0 }
  0x31   : > { %s300_s14 = scalar_lea.vmem [#allocation7], %s713_s29 }
  0x32   : > { %1078 = dma.done.wait (%p1229_p11), %s297_s7, 1040  }
  0x33   : > { %1080 = vsyncadd (%p1229_p11), %s297_s7, 4294966256  ;;  %s309_s2 = scalar_lea.vmem [#allocation9], %s1271_s1  ;;  %s316_s24 = scalar_lea.sflag [#allocation11], %s1271_s1 }
  0x34   : > { %s1280_s15 = scalar_lea.vmem [#allocation10], %s713_s29 }
  0x35   : > { %1082 = dma.done.wait (%p1229_p11), %s316_s24, 1024  }
  0x36   : > { %1084 = vsyncadd (%p1229_p11), %s316_s24, 4294966272  ;;  %p715_p1 = scmp.ne.s32.totalorder %s1103_s21, 0 }
  0x38   : > { %361 = sbr.rel (%p715_p1) target bundleno = 65 (0x41), region = 60 }
  0x3d   : > { %v363_v0 = vld [vmem:[#allocation4] sm:$0xff]  ;;  %v1117_v1 = vmov 0.0  }
  0x3e   : > { %362 = vst [vmem:[#allocation3] sm:$0xff] %v1117_v1  ;;  %v364_v2 = vpack.c.bf16 %v363_v0, %v363_v0 }
  0x40   : > { %365 = vst [vmem:[#allocation2] sm:$0xf] %v364_v2 }
  0x41 PF: > { %v795_v3 = vld [vmem:[%s300_s14 + $0x38] sm:$0xff]  ;;  %v794_v4 = vld [vmem:[%s300_s14 + $0x30] sm:$0xff]  ;;  %v793_v5 = vld [vmem:[%s300_s14 + $0x28] sm:$0xff]  ;;  %p781_p2 = scmp.ne.s32.totalorder %s1103_s21, 3 }
  0x42   : > { %435 = vmatpush.bf16.msra.mxu0 %v795_v3  ;;  %v792_v6 = vld [vmem:[%s300_s14 + $0x20] sm:$0xff]  ;;  %v791_v7 = vld [vmem:[%s300_s14 + $0x18] sm:$0xff]  ;;  %v790_v8 = vld [vmem:[%s300_s14 + $0x10] sm:$0xff] }
  0x43   : > { %v789_v9 = vld [vmem:[%s300_s14 + $0x8] sm:$0xff]  ;;  %v788_v10 = vld [vmem:[%s300_s14] sm:$0xff]  ;;  %v802_v13 = vld [vmem:[%s1280_s15 + $0x30] sm:$0xff] }
  0x44   : > { %v803_v12 = vld [vmem:[%s1280_s15 + $0x38] sm:$0xff]  ;;  %v801_v14 = vld [vmem:[%s1280_s15 + $0x28] sm:$0xff]  ;;  %v800_v15 = vld [vmem:[%s1280_s15 + $0x20] sm:$0xff] }
  0x45   : > { %534 = vmatpush.bf16.msra.mxu1 %v803_v12  ;;  %v799_v16 = vld [vmem:[%s1280_s15 + $0x18] sm:$0xff]  ;;  %v798_v17 = vld [vmem:[%s1280_s15 + $0x10] sm:$0xff]  ;;  %v797_v18 = vld [vmem:[%s1280_s15 + $0x8] sm:$0xff] }
  0x46   : > { %436 = vmatpush.bf16.msra.mxu0 %v794_v4  ;;  %v796_v19 = vld [vmem:[%s1280_s15] sm:$0xff]  ;;  %v891_v20 = vld [vmem:[%s309_s2] ss:$0 sm:$0xff]  ;;  %v468_v39 = vld [vmem:[#allocation3] sm:$0xff] }
  0x47   : > { %v366_v11 = vld [vmem:[#allocation2] sm:$0xf] }
  0x49   : > { %535 = vmatpush.bf16.msra.mxu1 %v802_v13 }
  0x4a   : > { %437 = vmatpush.bf16.msra.mxu0 %v793_v5 }
  0x4d   : > { %536 = vmatpush.bf16.msra.mxu1 %v801_v14 }
  0x4e   : > { %438 = vmatpush.bf16.msra.mxu0 %v792_v6 }
  0x51   : > { %537 = vmatpush.bf16.msra.mxu1 %v800_v15 }
  0x52   : > { %439 = vmatpush.bf16.msra.mxu0 %v791_v7 }
  0x55   : > { %538 = vmatpush.bf16.msra.mxu1 %v799_v16 }
  0x56   : > { %440 = vmatpush.bf16.msra.mxu0 %v790_v8 }
  0x59   : > { %539 = vmatpush.bf16.msra.mxu1 %v798_v17 }
  0x5a   : > { %441 = vmatpush.bf16.msra.mxu0 %v789_v9 }
  0x5d   : > { %540 = vmatpush.bf16.msra.mxu1 %v797_v18 }
  0x5e   : > { %442 = vmatpush.bf16.msra.mxu0 %v788_v10 }
  0x61   : > { %443 = vmatmul.bf16.vlgmr.msra.gmra.mxu0 %v366_v11  ;;  %541 = vmatpush.bf16.msra.mxu1 %v796_v19 }
  0xde   : > { %v444_v21 = vpop.f32.mrf.mxu0 }
  0xdf   : > { %v445_v22 = vadd.f32 %v891_v20, %v444_v21 }
  0xe1   : > { %v748_v23 = vmul.f32 -1.442695, %v445_v22 }
  0xe3   : > { %892 = vpow2.f32 %v748_v23 }
  0xe6   : > { %v446_v24 = vpop.f32.mrf.mxu0 }
  0xe9   : > { %v893_v25 = vpop.eup %892 }
  0xea   : > { %v451_v26 = vadd.f32 1.0, %v893_v25 }
  0xec   : > { %894 = vrcp.f32 %v451_v26  ;;  %v463_v30 = vand.u32 2147483648, %v451_v26  ;;  %v461_v32 = vand.u32 2147483647, %v451_v26  ;;  %vm457_vm1 = vweird.f32 %v451_v26 }
  0xee   : > { %v464_v34 = vor.u32 1.1754944e-38, %v463_v30  ;;  %vm462_vm3 = vcmp.eq.f32.partialorder %v461_v32, 8.507059e+37 }
  0xf2   : > { %v895_v27 = vpop.eup %894 }
  0xf3   : > { %v453_v28 = vmul.f32 %v895_v27, %v451_v26  ;;  %vm458_vm0 = vweird.f32 %v895_v27 }
  0xf4   : > { %vm459_vm2 = vmor %vm457_vm1, %vm458_vm0 }
  0xf5   : > { %v454_v29 = vsub.f32 1.0, %v453_v28 }
  0xf7   : > { %v455_v31 = vmul.f32 %v895_v27, %v454_v29 }
  0xf9   : > { %v456_v33 = vadd.f32 %v895_v27, %v455_v31 }
  0xfb   : > { %v460_v35 = vsel %vm459_vm2, %v895_v27, %v456_v33 }
  0xfc   : > { %v465_v36 = vsel %vm462_vm3, %v464_v34, %v460_v35 }
  0xfd   : > { %v467_v37 = vmul.f32 %v465_v36, %v445_v22 }
  0xff   : > { %v469_v38 = vpack.c.bf16 %v467_v37, %v467_v37 }
 0x101   : > { %542 = vmatmul.bf16.vlgmr.msra.gmra.mxu1 %v469_v38 }
 0x17e   : > { %v543_v40 = vpop.f32.mrf.mxu1 }
 0x17f   : > { %v547_v41 = vadd.f32 %v543_v40, %v468_v39 }
 0x181   : > { %548 = vst [vmem:[#allocation3] sm:$0xff] %v547_v41 }
 0x182   : > { %552 = sbr.rel (%p781_p2) target bundleno = 426 (0x1aa), region = 64 }
 0x186   : > { %v545_v42 = vpop.f32.mrf.mxu1 }
 0x187   : > { %v896_v44 = vld [vmem:[%s1327_s4] ss:$0 sm:$0xff] }
 0x188   : > { %v553_v43 = vld [vmem:[#allocation3] sm:$0xff] }
 0x189   : > { %v558_v45 = vadd.f32 %v896_v44, %v553_v43 }
 0x18b   : > { %v782_v46 = vmul.f32 -1.442695, %v558_v45 }
 0x18d   : > { %897 = vpow2.f32 %v782_v46 }
 0x193   : > { %v898_v47 = vpop.eup %897 }
 0x194   : > { %v562_v48 = vadd.f32 1.0, %v898_v47 }
 0x196   : > { %899 = vrcp.f32 %v562_v48  ;;  %v574_v51 = vand.u32 2147483648, %v562_v48  ;;  %vm568_vm4 = vweird.f32 %v562_v48  ;;  %v572_v53 = vand.u32 2147483647, %v562_v48 }
 0x198   : > { %v575_v55 = vor.u32 1.1754944e-38, %v574_v51  ;;  %vm573_vm7 = vcmp.eq.f32.partialorder %v572_v53, 8.507059e+37 }
 0x19c   : > { %v900_v49 = vpop.eup %899 }
 0x19d   : > { %v564_v50 = vmul.f32 %v900_v49, %v562_v48  ;;  %vm569_vm5 = vweird.f32 %v900_v49 }
 0x19e   : > { %vm570_vm6 = vmor %vm568_vm4, %vm569_vm5 }
 0x19f   : > { %v565_v52 = vsub.f32 1.0, %v564_v50 }
 0x1a1   : > { %v566_v54 = vmul.f32 %v900_v49, %v565_v52 }
 0x1a3   : > { %v567_v56 = vadd.f32 %v900_v49, %v566_v54 }
 0x1a5   : > { %v571_v57 = vsel %vm570_vm6, %v900_v49, %v567_v56 }
 0x1a6   : > { %v576_v58 = vsel %vm573_vm7, %v575_v55, %v571_v57 }
 0x1a7   : > { %v578_v59 = vmul.f32 %v576_v58, %v558_v45 }
 0x1a9   : > { %579 = vst [vmem:[#allocation12] sm:$0xff] %v578_v59 }
 0x1aa PF: > { %p835_p3 = scmp.eq.s32.totalorder %s1220_s27, 3  ;;  %s588_s8 = sshll.u32 %s1328_s5, 4  ;;  %s589_s8 = int_to_ptr.hbm [resolvable:$true] %s588_s8 }
 0x1ab   : > { %s1118_s9 = smov [#allocation12]  }
 0x1ac   : > { %s586_s10 = sshll.u32 %s1118_s9, 4  ;;  %s587_s10 = int_to_ptr.vmem [resolvable:$true] %s586_s10 }
 0x1ad   : > { %815 = dma.vmem_to_hbm [thread:$0]  (%p835_p3), %s587_s10, 128, %s589_s8, [#allocation6]  }
 0x1ae   : > { %1086 = dma.done.wait (%p835_p3), [#allocation6], 128  }
 0x1af   : > { %1088 = vsyncadd (%p835_p3), [#allocation6], 4294967168 }
 0x1b0 PF: > { %s23_s23 = sadd.s32 1, %s1111_s23   ;;  %s1345_s27 = sld [smem:[#allocation17_spill]] }
 0x1b1   : > { %p20_p4 = scmp.ge.s32.totalorder %s23_s23, 6   ;;  %s1346_s18 = smov %s1095_s19 }
 0x1b2   : > { %s1347_s19 = smov %s1099_s20  ;;  %s1348_s20 = smov %s1199_s6 }
 0x1b3   : > { %s1349_s21 = smov %s1107_s22  ;;  %22 = sbr.rel (!%p20_p4) target bundleno = 12 (0xc), region = 114 }
 0x1b6   : > { %s1350_s22 = smov %s1345_s27 }
 0x1b8   :  { %602 = vsyncpa [#allocation5], 1 }
 0x1b9   :  { %604 = vsyncpa [#allocation5 + $0x1], 1 }
 0x1ba   :  { %605 = vsyncpa [#allocation8], 1 }
 0x1bb   :  { %607 = vsyncpa [#allocation8 + $0x1], 1 }
 0x1bc   :  { %608 = vsyncpa [#allocation11], 1 }
 0x1bd   :  { %610 = vsyncpa [#allocation11 + $0x1], 1 }
 0x1be   :  { %611 = vsyncpa [#allocation6], 1 }
 0x1bf   :  { %613 = vsyncpa [#allocation6 + $0x1], 1 }

</bundles_post_ra>
